<compile_context>
chip_gen: v5e
topology: v5e:2x2
jax: 0.10.0
libtpu: 0.0.40
codegen_flags: <defaults>
</compile_context>

<pallas_src>
import math
from functools import partial

import jax
import jax.numpy as jnp
from jax.experimental import pallas as pl
from jax.experimental.pallas import tpu as pltpu

# ----- problem sizes (small, consistent with the module) -----
BATCH = 2          # b
SEQ = 8            # t
EMB = 32           # e
HEADS = 4          # h


def self_attention_kernel(x_ref, w_ref, bu_ref, o_ref, *, causal):
    """Full self-attention for one tiny (B, T, E) block.

    w_ref is a packed (3, H, E, E) slab:
      [0] = per-head query weights (1/e**0.25 scale folded in)
      [1] = per-head key   weights (1/e**0.25 scale folded in)
      [2] = per-head tovalues_h @ unifyheads_h  (folded value->unify chain)
    """
    B, T, E = x_ref.shape
    H = w_ref.shape[1]

    if causal:
        # mask_(dot, maskval=-inf, mask_diagonal=False): strictly upper triangle.
        row = jax.lax.broadcasted_iota(jnp.int32, (T, T), 0)
        col = jax.lax.broadcasted_iota(jnp.int32, (T, T), 1)
        neg = jnp.where(col > row, -jnp.inf, 0.0).astype(jnp.float32)

    bias = bu_ref[...]                                        # (1, E)

    for b in range(B):                                        # static unroll, B*H = 8 iters
        xb = x_ref[b]                                         # (T, E)
        acc = jnp.broadcast_to(bias, (T, E))                  # unifyheads bias
        for h in range(H):
            q = jnp.dot(xb, w_ref[0, h], preferred_element_type=jnp.float32)  # (T, E)
            k = jnp.dot(xb, w_ref[1, h], preferred_element_type=jnp.float32)  # (T, E)
            # q @ k.T without materializing a transpose.
            s = jax.lax.dot_general(q, k, (((1,), (1,)), ((), ())),
                                    preferred_element_type=jnp.float32)       # (T, T)
            if causal:
                s = s + neg
            m = jnp.max(s, axis=-1, keepdims=True)
            p = jnp.exp(s - m)
            p = p / jnp.sum(p, axis=-1, keepdims=True)        # softmax over keys
            # softmax(QK^T) @ (X @ Wv_h @ Wu_h) == this head's unifyheads contribution
            vu = jnp.dot(xb, w_ref[2, h], preferred_element_type=jnp.float32)  # (T, E)
            acc = acc + jnp.dot(p, vu, preferred_element_type=jnp.float32)
        o_ref[b] = acc


def self_attention_forward(x, params, *, causal=False, mask=None):
    """Mirror of SelfAttention.forward(x, mask) for mask=None (causal = self.mask)."""
    if mask is not None:
        # TODO(synk): runtime `mask` tensor (dot.masked_fill(mask == 0, -1e9)) not implemented.
        raise NotImplementedError("only mask=None is supported")

    B, T, E = x.shape
    H = HEADS

    # ---- fold linear chains offline (constant-folded once by XLA) ----
    scale = E ** -0.25
    wq_h = jnp.transpose(params["wq"].reshape(E, H, E), (1, 0, 2)) * scale   # (H, E, E)
    wk_h = jnp.transpose(params["wk"].reshape(E, H, E), (1, 0, 2)) * scale   # (H, E, E)
    wv_h = params["wv"].reshape(E, H, E)                                     # (E, H, E)
    wu_h = params["wu"].reshape(H, E, E)                                     # (H, E, E)
    wvu = jnp.einsum("ehf,hfg->heg", wv_h, wu_h)                             # (H, E, E)
    w_pack = jnp.stack([wq_h, wk_h, wvu], axis=0)                            # (3, H, E, E)
    bu = params["bu"].reshape(1, E)

    kernel = partial(self_attention_kernel, causal=causal)
    out = pl.pallas_call(
        kernel,
        out_shape=jax.ShapeDtypeStruct((B, T, E), jnp.float32),
        grid=(1,),
        in_specs=[
            pl.BlockSpec((B, T, E), lambda i: (0, 0, 0)),        # x
            pl.BlockSpec((3, H, E, E), lambda i: (0, 0, 0, 0)),  # packed weights
            pl.BlockSpec((1, E), lambda i: (0, 0)),              # unifyheads bias
        ],
        out_specs=pl.BlockSpec((B, T, E), lambda i: (0, 0, 0)),
        compiler_params=pltpu.CompilerParams(
            dimension_semantics=("arbitrary",)),
    )(x, w_pack, bu)
    return out


def init_params(key):
    """Weights stored in x @ W layout (i.e. torch weight.T)."""
    ks = jax.random.split(key, 5)
    s_in = 1.0 / math.sqrt(EMB)
    s_u = 1.0 / math.sqrt(HEADS * EMB)
    return dict(
        wk=(s_in * jax.random.normal(ks[0], (EMB, HEADS * EMB))).astype(jnp.float32),
        wq=(s_in * jax.random.normal(ks[1], (EMB, HEADS * EMB))).astype(jnp.float32),
        wv=(s_in * jax.random.normal(ks[2], (EMB, HEADS * EMB))).astype(jnp.float32),
        wu=(s_u * jax.random.normal(ks[3], (HEADS * EMB, EMB))).astype(jnp.float32),
        bu=(0.05 * jax.random.normal(ks[4], (EMB,))).astype(jnp.float32),
    )


def reference_forward(x, p, *, causal=False):
    """Pure-JAX reference mirroring the torch forward exactly (no folding)."""
    b, t, e = x.shape
    h = HEADS
    xf = x.reshape(b * t, e)
    keys = (xf @ p["wk"]).reshape(b, t, h, e)
    queries = (xf @ p["wq"]).reshape(b, t, h, e)
    values = (xf @ p["wv"]).reshape(b, t, h, e)
    keys = jnp.transpose(keys, (0, 2, 1, 3)).reshape(b * h, t, e)
    queries = jnp.transpose(queries, (0, 2, 1, 3)).reshape(b * h, t, e)
    values = jnp.transpose(values, (0, 2, 1, 3)).reshape(b * h, t, e)
    queries = queries / e ** 0.25
    keys = keys / e ** 0.25
    dot = jnp.einsum("bte,bse->bts", queries, keys)          # (b*h, t, t)
    if causal:
        row = jnp.arange(t)[:, None]
        col = jnp.arange(t)[None, :]
        dot = jnp.where(col > row, -jnp.inf, dot)
    dot = jax.nn.softmax(dot, axis=2)
    out = jnp.einsum("bts,bse->bte", dot, values).reshape(b, h, t, e)
    out = jnp.transpose(out, (0, 2, 1, 3)).reshape(b, t, h * e)
    return out @ p["wu"] + p["bu"]


if __name__ == "__main__":
    key = jax.random.PRNGKey(0)
    k_x, k_p = jax.random.split(key)
    x = jax.random.normal(k_x, (BATCH, SEQ, EMB), dtype=jnp.float32)
    params = init_params(k_p)

    for causal in (False, True):
        y = self_attention_forward(x, params, causal=causal)
        jax.block_until_ready(y)
        y_ref = reference_forward(x, params, causal=causal)
        assert y.shape == (BATCH, SEQ, EMB)
        assert jnp.allclose(y, y_ref, rtol=1e-3, atol=1e-4), f"mismatch (causal={causal})"

    print("KERNEL_OK")
</pallas_src>

<mosaic_0001>
module attributes {stable_mosaic.version = 11 : i64} {
  func.func @self_attention_kernel(%arg0: i32, %arg1: memref<2x8x32xf32, #tpu.memory_space<vmem>>, %arg2: memref<3x4x32x32xf32, #tpu.memory_space<vmem>>, %arg3: memref<1x32xf32, #tpu.memory_space<vmem>>, %arg4: memref<2x8x32xf32, #tpu.memory_space<vmem>>) attributes {dimension_semantics = [#tpu.dimension_semantics<arbitrary>], iteration_bounds = array<i64: 1>, scalar_prefetch = 0 : i64, scratch_operands = 0 : i64, tpu.core_type = #tpu.core_type<tc>, window_params = [{pipeline_mode = #tpu.pipeline_mode<synchronous>, transform_indices = @transform_0, window_bounds = array<i64: 2, 8, 32>}, {pipeline_mode = #tpu.pipeline_mode<synchronous>, transform_indices = @transform_1, window_bounds = array<i64: 3, 4, 32, 32>}, {pipeline_mode = #tpu.pipeline_mode<synchronous>, transform_indices = @transform_2, window_bounds = array<i64: 1, 32>}, {pipeline_mode = #tpu.pipeline_mode<synchronous>, transform_indices = @transform_3, window_bounds = array<i64: 2, 8, 32>}]} {
    %c0 = arith.constant 0 : index
    %c0_0 = arith.constant 0 : index
    %0 = vector.load %arg3[%c0, %c0_0] : memref<1x32xf32, #tpu.memory_space<vmem>>, vector<1x32xf32>
    %c0_1 = arith.constant 0 : index
    %c0_2 = arith.constant 0 : index
    %c0_3 = arith.constant 0 : index
    %1 = vector.load %arg1[%c0_1, %c0_2, %c0_3] : memref<2x8x32xf32, #tpu.memory_space<vmem>>, vector<1x8x32xf32>
    %2 = vector.shape_cast %1 : vector<1x8x32xf32> to vector<8x32xf32>
    %3 = vector.shape_cast %0 : vector<1x32xf32> to vector<1x32xf32>
    %4 = vector.broadcast %3 : vector<1x32xf32> to vector<8x32xf32>
    %c0_4 = arith.constant 0 : index
    %c0_5 = arith.constant 0 : index
    %c0_6 = arith.constant 0 : index
    %c0_7 = arith.constant 0 : index
    %5 = vector.load %arg2[%c0_4, %c0_5, %c0_6, %c0_7] : memref<3x4x32x32xf32, #tpu.memory_space<vmem>>, vector<1x1x32x32xf32>
    %6 = vector.shape_cast %5 : vector<1x1x32x32xf32> to vector<32x32xf32>
    %cst = arith.constant dense<0.000000e+00> : vector<8x32xf32>
    %7 = tpu.matmul %2, %6, %cst {dimension_numbers = #tpu.dot_dimension_numbers<[1], [0], [0], [1], [0, 0, 1, 1], [], []>} : vector<8x32xf32>, vector<32x32xf32>, vector<8x32xf32> -> vector<8x32xf32>
    %c1 = arith.constant 1 : index
    %c0_8 = arith.constant 0 : index
    %c0_9 = arith.constant 0 : index
    %c0_10 = arith.constant 0 : index
    %8 = vector.load %arg2[%c1, %c0_8, %c0_9, %c0_10] : memref<3x4x32x32xf32, #tpu.memory_space<vmem>>, vector<1x1x32x32xf32>
    %9 = vector.shape_cast %8 : vector<1x1x32x32xf32> to vector<32x32xf32>
    %cst_11 = arith.constant dense<0.000000e+00> : vector<8x32xf32>
    %10 = tpu.matmul %2, %9, %cst_11 {dimension_numbers = #tpu.dot_dimension_numbers<[1], [0], [0], [1], [0, 0, 1, 1], [], []>} : vector<8x32xf32>, vector<32x32xf32>, vector<8x32xf32> -> vector<8x32xf32>
    %cst_12 = arith.constant dense<0.000000e+00> : vector<8x8xf32>
    %11 = tpu.matmul %7, %10, %cst_12 {dimension_numbers = #tpu.dot_dimension_numbers<[1], [1], [0], [0], [0, 0, 1, 0], [], []>} : vector<8x32xf32>, vector<8x32xf32>, vector<8x8xf32> -> vector<8x8xf32>
    %cst_13 = arith.constant dense<0xFF800000> : vector<8xf32>
    %12 = vector.multi_reduction <maximumf>, %11, %cst_13 [1] : vector<8x8xf32> to vector<8xf32>
    %13 = vector.shape_cast %12 : vector<8xf32> to vector<8x1xf32>
    %14 = vector.broadcast %13 : vector<8x1xf32> to vector<8x8xf32>
    %15 = arith.subf %11, %14 : vector<8x8xf32>
    %16 = math.exp %15 : vector<8x8xf32>
    %cst_14 = arith.constant dense<0.000000e+00> : vector<8xf32>
    %17 = vector.multi_reduction <add>, %16, %cst_14 [1] : vector<8x8xf32> to vector<8xf32>
    %18 = vector.shape_cast %17 : vector<8xf32> to vector<8x1xf32>
    %19 = vector.broadcast %18 : vector<8x1xf32> to vector<8x8xf32>
    %20 = arith.divf %16, %19 : vector<8x8xf32>
    %c2 = arith.constant 2 : index
    %c0_15 = arith.constant 0 : index
    %c0_16 = arith.constant 0 : index
    %c0_17 = arith.constant 0 : index
    %21 = vector.load %arg2[%c2, %c0_15, %c0_16, %c0_17] : memref<3x4x32x32xf32, #tpu.memory_space<vmem>>, vector<1x1x32x32xf32>
    %22 = vector.shape_cast %21 : vector<1x1x32x32xf32> to vector<32x32xf32>
    %cst_18 = arith.constant dense<0.000000e+00> : vector<8x32xf32>
    %23 = tpu.matmul %2, %22, %cst_18 {dimension_numbers = #tpu.dot_dimension_numbers<[1], [0], [0], [1], [0, 0, 1, 1], [], []>} : vector<8x32xf32>, vector<32x32xf32>, vector<8x32xf32> -> vector<8x32xf32>
    %cst_19 = arith.constant dense<0.000000e+00> : vector<8x32xf32>
    %24 = tpu.matmul %20, %23, %cst_19 {dimension_numbers = #tpu.dot_dimension_numbers<[1], [0], [0], [1], [0, 0, 1, 1], [], []>} : vector<8x8xf32>, vector<8x32xf32>, vector<8x32xf32> -> vector<8x32xf32>
    %25 = arith.addf %4, %24 : vector<8x32xf32>
    %c0_20 = arith.constant 0 : index
    %c1_21 = arith.constant 1 : index
    %c0_22 = arith.constant 0 : index
    %c0_23 = arith.constant 0 : index
    %26 = vector.load %arg2[%c0_20, %c1_21, %c0_22, %c0_23] : memref<3x4x32x32xf32, #tpu.memory_space<vmem>>, vector<1x1x32x32xf32>
    %27 = vector.shape_cast %26 : vector<1x1x32x32xf32> to vector<32x32xf32>
    %cst_24 = arith.constant dense<0.000000e+00> : vector<8x32xf32>
    %28 = tpu.matmul %2, %27, %cst_24 {dimension_numbers = #tpu.dot_dimension_numbers<[1], [0], [0], [1], [0, 0, 1, 1], [], []>} : vector<8x32xf32>, vector<32x32xf32>, vector<8x32xf32> -> vector<8x32xf32>
    %c1_25 = arith.constant 1 : index
    %c1_26 = arith.constant 1 : index
    %c0_27 = arith.constant 0 : index
    %c0_28 = arith.constant 0 : index
    %29 = vector.load %arg2[%c1_25, %c1_26, %c0_27, %c0_28] : memref<3x4x32x32xf32, #tpu.memory_space<vmem>>, vector<1x1x32x32xf32>
    %30 = vector.shape_cast %29 : vector<1x1x32x32xf32> to vector<32x32xf32>
    %cst_29 = arith.constant dense<0.000000e+00> : vector<8x32xf32>
    %31 = tpu.matmul %2, %30, %cst_29 {dimension_numbers = #tpu.dot_dimension_numbers<[1], [0], [0], [1], [0, 0, 1, 1], [], []>} : vector<8x32xf32>, vector<32x32xf32>, vector<8x32xf32> -> vector<8x32xf32>
    %cst_30 = arith.constant dense<0.000000e+00> : vector<8x8xf32>
    %32 = tpu.matmul %28, %31, %cst_30 {dimension_numbers = #tpu.dot_dimension_numbers<[1], [1], [0], [0], [0, 0, 1, 0], [], []>} : vector<8x32xf32>, vector<8x32xf32>, vector<8x8xf32> -> vector<8x8xf32>
    %cst_31 = arith.constant dense<0xFF800000> : vector<8xf32>
    %33 = vector.multi_reduction <maximumf>, %32, %cst_31 [1] : vector<8x8xf32> to vector<8xf32>
    %34 = vector.shape_cast %33 : vector<8xf32> to vector<8x1xf32>
    %35 = vector.broadcast %34 : vector<8x1xf32> to vector<8x8xf32>
    %36 = arith.subf %32, %35 : vector<8x8xf32>
    %37 = math.exp %36 : vector<8x8xf32>
    %cst_32 = arith.constant dense<0.000000e+00> : vector<8xf32>
    %38 = vector.multi_reduction <add>, %37, %cst_32 [1] : vector<8x8xf32> to vector<8xf32>
    %39 = vector.shape_cast %38 : vector<8xf32> to vector<8x1xf32>
    %40 = vector.broadcast %39 : vector<8x1xf32> to vector<8x8xf32>
    %41 = arith.divf %37, %40 : vector<8x8xf32>
    %c2_33 = arith.constant 2 : index
    %c1_34 = arith.constant 1 : index
    %c0_35 = arith.constant 0 : index
    %c0_36 = arith.constant 0 : index
    %42 = vector.load %arg2[%c2_33, %c1_34, %c0_35, %c0_36] : memref<3x4x32x32xf32, #tpu.memory_space<vmem>>, vector<1x1x32x32xf32>
    %43 = vector.shape_cast %42 : vector<1x1x32x32xf32> to vector<32x32xf32>
    %cst_37 = arith.constant dense<0.000000e+00> : vector<8x32xf32>
    %44 = tpu.matmul %2, %43, %cst_37 {dimension_numbers = #tpu.dot_dimension_numbers<[1], [0], [0], [1], [0, 0, 1, 1], [], []>} : vector<8x32xf32>, vector<32x32xf32>, vector<8x32xf32> -> vector<8x32xf32>
    %cst_38 = arith.constant dense<0.000000e+00> : vector<8x32xf32>
    %45 = tpu.matmul %41, %44, %cst_38 {dimension_numbers = #tpu.dot_dimension_numbers<[1], [0], [0], [1], [0, 0, 1, 1], [], []>} : vector<8x8xf32>, vector<8x32xf32>, vector<8x32xf32> -> vector<8x32xf32>
    %46 = arith.addf %25, %45 : vector<8x32xf32>
    %c0_39 = arith.constant 0 : index
    %c2_40 = arith.constant 2 : index
    %c0_41 = arith.constant 0 : index
    %c0_42 = arith.constant 0 : index
    %47 = vector.load %arg2[%c0_39, %c2_40, %c0_41, %c0_42] : memref<3x4x32x32xf32, #tpu.memory_space<vmem>>, vector<1x1x32x32xf32>
    %48 = vector.shape_cast %47 : vector<1x1x32x32xf32> to vector<32x32xf32>
    %cst_43 = arith.constant dense<0.000000e+00> : vector<8x32xf32>
    %49 = tpu.matmul %2, %48, %cst_43 {dimension_numbers = #tpu.dot_dimension_numbers<[1], [0], [0], [1], [0, 0, 1, 1], [], []>} : vector<8x32xf32>, vector<32x32xf32>, vector<8x32xf32> -> vector<8x32xf32>
    %c1_44 = arith.constant 1 : index
    %c2_45 = arith.constant 2 : index
    %c0_46 = arith.constant 0 : index
    %c0_47 = arith.constant 0 : index
    %50 = vector.load %arg2[%c1_44, %c2_45, %c0_46, %c0_47] : memref<3x4x32x32xf32, #tpu.memory_space<vmem>>, vector<1x1x32x32xf32>
    %51 = vector.shape_cast %50 : vector<1x1x32x32xf32> to vector<32x32xf32>
    %cst_48 = arith.constant dense<0.000000e+00> : vector<8x32xf32>
    %52 = tpu.matmul %2, %51, %cst_48 {dimension_numbers = #tpu.dot_dimension_numbers<[1], [0], [0], [1], [0, 0, 1, 1], [], []>} : vector<8x32xf32>, vector<32x32xf32>, vector<8x32xf32> -> vector<8x32xf32>
    %cst_49 = arith.constant dense<0.000000e+00> : vector<8x8xf32>
    %53 = tpu.matmul %49, %52, %cst_49 {dimension_numbers = #tpu.dot_dimension_numbers<[1], [1], [0], [0], [0, 0, 1, 0], [], []>} : vector<8x32xf32>, vector<8x32xf32>, vector<8x8xf32> -> vector<8x8xf32>
    %cst_50 = arith.constant dense<0xFF800000> : vector<8xf32>
    %54 = vector.multi_reduction <maximumf>, %53, %cst_50 [1] : vector<8x8xf32> to vector<8xf32>
    %55 = vector.shape_cast %54 : vector<8xf32> to vector<8x1xf32>
    %56 = vector.broadcast %55 : vector<8x1xf32> to vector<8x8xf32>
    %57 = arith.subf %53, %56 : vector<8x8xf32>
    %58 = math.exp %57 : vector<8x8xf32>
    %cst_51 = arith.constant dense<0.000000e+00> : vector<8xf32>
    %59 = vector.multi_reduction <add>, %58, %cst_51 [1] : vector<8x8xf32> to vector<8xf32>
    %60 = vector.shape_cast %59 : vector<8xf32> to vector<8x1xf32>
    %61 = vector.broadcast %60 : vector<8x1xf32> to vector<8x8xf32>
    %62 = arith.divf %58, %61 : vector<8x8xf32>
    %c2_52 = arith.constant 2 : index
    %c2_53 = arith.constant 2 : index
    %c0_54 = arith.constant 0 : index
    %c0_55 = arith.constant 0 : index
    %63 = vector.load %arg2[%c2_52, %c2_53, %c0_54, %c0_55] : memref<3x4x32x32xf32, #tpu.memory_space<vmem>>, vector<1x1x32x32xf32>
    %64 = vector.shape_cast %63 : vector<1x1x32x32xf32> to vector<32x32xf32>
    %cst_56 = arith.constant dense<0.000000e+00> : vector<8x32xf32>
    %65 = tpu.matmul %2, %64, %cst_56 {dimension_numbers = #tpu.dot_dimension_numbers<[1], [0], [0], [1], [0, 0, 1, 1], [], []>} : vector<8x32xf32>, vector<32x32xf32>, vector<8x32xf32> -> vector<8x32xf32>
    %cst_57 = arith.constant dense<0.000000e+00> : vector<8x32xf32>
    %66 = tpu.matmul %62, %65, %cst_57 {dimension_numbers = #tpu.dot_dimension_numbers<[1], [0], [0], [1], [0, 0, 1, 1], [], []>} : vector<8x8xf32>, vector<8x32xf32>, vector<8x32xf32> -> vector<8x32xf32>
    %67 = arith.addf %46, %66 : vector<8x32xf32>
    %c0_58 = arith.constant 0 : index
    %c3 = arith.constant 3 : index
    %c0_59 = arith.constant 0 : index
    %c0_60 = arith.constant 0 : index
    %68 = vector.load %arg2[%c0_58, %c3, %c0_59, %c0_60] : memref<3x4x32x32xf32, #tpu.memory_space<vmem>>, vector<1x1x32x32xf32>
    %69 = vector.shape_cast %68 : vector<1x1x32x32xf32> to vector<32x32xf32>
    %cst_61 = arith.constant dense<0.000000e+00> : vector<8x32xf32>
    %70 = tpu.matmul %2, %69, %cst_61 {dimension_numbers = #tpu.dot_dimension_numbers<[1], [0], [0], [1], [0, 0, 1, 1], [], []>} : vector<8x32xf32>, vector<32x32xf32>, vector<8x32xf32> -> vector<8x32xf32>
    %c1_62 = arith.constant 1 : index
    %c3_63 = arith.constant 3 : index
    %c0_64 = arith.constant 0 : index
    %c0_65 = arith.constant 0 : index
    %71 = vector.load %arg2[%c1_62, %c3_63, %c0_64, %c0_65] : memref<3x4x32x32xf32, #tpu.memory_space<vmem>>, vector<1x1x32x32xf32>
    %72 = vector.shape_cast %71 : vector<1x1x32x32xf32> to vector<32x32xf32>
    %cst_66 = arith.constant dense<0.000000e+00> : vector<8x32xf32>
    %73 = tpu.matmul %2, %72, %cst_66 {dimension_numbers = #tpu.dot_dimension_numbers<[1], [0], [0], [1], [0, 0, 1, 1], [], []>} : vector<8x32xf32>, vector<32x32xf32>, vector<8x32xf32> -> vector<8x32xf32>
    %cst_67 = arith.constant dense<0.000000e+00> : vector<8x8xf32>
    %74 = tpu.matmul %70, %73, %cst_67 {dimension_numbers = #tpu.dot_dimension_numbers<[1], [1], [0], [0], [0, 0, 1, 0], [], []>} : vector<8x32xf32>, vector<8x32xf32>, vector<8x8xf32> -> vector<8x8xf32>
    %cst_68 = arith.constant dense<0xFF800000> : vector<8xf32>
    %75 = vector.multi_reduction <maximumf>, %74, %cst_68 [1] : vector<8x8xf32> to vector<8xf32>
    %76 = vector.shape_cast %75 : vector<8xf32> to vector<8x1xf32>
    %77 = vector.broadcast %76 : vector<8x1xf32> to vector<8x8xf32>
    %78 = arith.subf %74, %77 : vector<8x8xf32>
    %79 = math.exp %78 : vector<8x8xf32>
    %cst_69 = arith.constant dense<0.000000e+00> : vector<8xf32>
    %80 = vector.multi_reduction <add>, %79, %cst_69 [1] : vector<8x8xf32> to vector<8xf32>
    %81 = vector.shape_cast %80 : vector<8xf32> to vector<8x1xf32>
    %82 = vector.broadcast %81 : vector<8x1xf32> to vector<8x8xf32>
    %83 = arith.divf %79, %82 : vector<8x8xf32>
    %c2_70 = arith.constant 2 : index
    %c3_71 = arith.constant 3 : index
    %c0_72 = arith.constant 0 : index
    %c0_73 = arith.constant 0 : index
    %84 = vector.load %arg2[%c2_70, %c3_71, %c0_72, %c0_73] : memref<3x4x32x32xf32, #tpu.memory_space<vmem>>, vector<1x1x32x32xf32>
    %85 = vector.shape_cast %84 : vector<1x1x32x32xf32> to vector<32x32xf32>
    %cst_74 = arith.constant dense<0.000000e+00> : vector<8x32xf32>
    %86 = tpu.matmul %2, %85, %cst_74 {dimension_numbers = #tpu.dot_dimension_numbers<[1], [0], [0], [1], [0, 0, 1, 1], [], []>} : vector<8x32xf32>, vector<32x32xf32>, vector<8x32xf32> -> vector<8x32xf32>
    %cst_75 = arith.constant dense<0.000000e+00> : vector<8x32xf32>
    %87 = tpu.matmul %83, %86, %cst_75 {dimension_numbers = #tpu.dot_dimension_numbers<[1], [0], [0], [1], [0, 0, 1, 1], [], []>} : vector<8x8xf32>, vector<8x32xf32>, vector<8x32xf32> -> vector<8x32xf32>
    %88 = arith.addf %67, %87 : vector<8x32xf32>
    %c0_76 = arith.constant 0 : index
    %c0_77 = arith.constant 0 : index
    %c0_78 = arith.constant 0 : index
    %89 = vector.load %arg4[%c0_76, %c0_77, %c0_78] : memref<2x8x32xf32, #tpu.memory_space<vmem>>, vector<1x8x32xf32>
    %90 = vector.shape_cast %89 : vector<1x8x32xf32> to vector<8x32xf32>
    %91 = vector.shape_cast %88 : vector<8x32xf32> to vector<1x8x32xf32>
    tpu.vector_store %arg4[%c0_76, %c0_77, %c0_78], %91 {strides = array<i32>} : memref<2x8x32xf32, #tpu.memory_space<vmem>>, vector<1x8x32xf32>,
    %c1_79 = arith.constant 1 : index
    %c0_80 = arith.constant 0 : index
    %c0_81 = arith.constant 0 : index
    %92 = vector.load %arg1[%c1_79, %c0_80, %c0_81] : memref<2x8x32xf32, #tpu.memory_space<vmem>>, vector<1x8x32xf32>
    %93 = vector.shape_cast %92 : vector<1x8x32xf32> to vector<8x32xf32>
    %94 = vector.shape_cast %0 : vector<1x32xf32> to vector<1x32xf32>
    %95 = vector.broadcast %94 : vector<1x32xf32> to vector<8x32xf32>
    %c0_82 = arith.constant 0 : index
    %c0_83 = arith.constant 0 : index
    %c0_84 = arith.constant 0 : index
    %c0_85 = arith.constant 0 : index
    %96 = vector.load %arg2[%c0_82, %c0_83, %c0_84, %c0_85] : memref<3x4x32x32xf32, #tpu.memory_space<vmem>>, vector<1x1x32x32xf32>
    %97 = vector.shape_cast %96 : vector<1x1x32x32xf32> to vector<32x32xf32>
    %cst_86 = arith.constant dense<0.000000e+00> : vector<8x32xf32>
    %98 = tpu.matmul %93, %97, %cst_86 {dimension_numbers = #tpu.dot_dimension_numbers<[1], [0], [0], [1], [0, 0, 1, 1], [], []>} : vector<8x32xf32>, vector<32x32xf32>, vector<8x32xf32> -> vector<8x32xf32>
    %c1_87 = arith.constant 1 : index
    %c0_88 = arith.constant 0 : index
    %c0_89 = arith.constant 0 : index
    %c0_90 = arith.constant 0 : index
    %99 = vector.load %arg2[%c1_87, %c0_88, %c0_89, %c0_90] : memref<3x4x32x32xf32, #tpu.memory_space<vmem>>, vector<1x1x32x32xf32>
    %100 = vector.shape_cast %99 : vector<1x1x32x32xf32> to vector<32x32xf32>
    %cst_91 = arith.constant dense<0.000000e+00> : vector<8x32xf32>
    %101 = tpu.matmul %93, %100, %cst_91 {dimension_numbers = #tpu.dot_dimension_numbers<[1], [0], [0], [1], [0, 0, 1, 1], [], []>} : vector<8x32xf32>, vector<32x32xf32>, vector<8x32xf32> -> vector<8x32xf32>
    %cst_92 = arith.constant dense<0.000000e+00> : vector<8x8xf32>
    %102 = tpu.matmul %98, %101, %cst_92 {dimension_numbers = #tpu.dot_dimension_numbers<[1], [1], [0], [0], [0, 0, 1, 0], [], []>} : vector<8x32xf32>, vector<8x32xf32>, vector<8x8xf32> -> vector<8x8xf32>
    %cst_93 = arith.constant dense<0xFF800000> : vector<8xf32>
    %103 = vector.multi_reduction <maximumf>, %102, %cst_93 [1] : vector<8x8xf32> to vector<8xf32>
    %104 = vector.shape_cast %103 : vector<8xf32> to vector<8x1xf32>
    %105 = vector.broadcast %104 : vector<8x1xf32> to vector<8x8xf32>
    %106 = arith.subf %102, %105 : vector<8x8xf32>
    %107 = math.exp %106 : vector<8x8xf32>
    %cst_94 = arith.constant dense<0.000000e+00> : vector<8xf32>
    %108 = vector.multi_reduction <add>, %107, %cst_94 [1] : vector<8x8xf32> to vector<8xf32>
    %109 = vector.shape_cast %108 : vector<8xf32> to vector<8x1xf32>
    %110 = vector.broadcast %109 : vector<8x1xf32> to vector<8x8xf32>
    %111 = arith.divf %107, %110 : vector<8x8xf32>
    %c2_95 = arith.constant 2 : index
    %c0_96 = arith.constant 0 : index
    %c0_97 = arith.constant 0 : index
    %c0_98 = arith.constant 0 : index
    %112 = vector.load %arg2[%c2_95, %c0_96, %c0_97, %c0_98] : memref<3x4x32x32xf32, #tpu.memory_space<vmem>>, vector<1x1x32x32xf32>
    %113 = vector.shape_cast %112 : vector<1x1x32x32xf32> to vector<32x32xf32>
    %cst_99 = arith.constant dense<0.000000e+00> : vector<8x32xf32>
    %114 = tpu.matmul %93, %113, %cst_99 {dimension_numbers = #tpu.dot_dimension_numbers<[1], [0], [0], [1], [0, 0, 1, 1], [], []>} : vector<8x32xf32>, vector<32x32xf32>, vector<8x32xf32> -> vector<8x32xf32>
    %cst_100 = arith.constant dense<0.000000e+00> : vector<8x32xf32>
    %115 = tpu.matmul %111, %114, %cst_100 {dimension_numbers = #tpu.dot_dimension_numbers<[1], [0], [0], [1], [0, 0, 1, 1], [], []>} : vector<8x8xf32>, vector<8x32xf32>, vector<8x32xf32> -> vector<8x32xf32>
    %116 = arith.addf %95, %115 : vector<8x32xf32>
    %c0_101 = arith.constant 0 : index
    %c1_102 = arith.constant 1 : index
    %c0_103 = arith.constant 0 : index
    %c0_104 = arith.constant 0 : index
    %117 = vector.load %arg2[%c0_101, %c1_102, %c0_103, %c0_104] : memref<3x4x32x32xf32, #tpu.memory_space<vmem>>, vector<1x1x32x32xf32>
    %118 = vector.shape_cast %117 : vector<1x1x32x32xf32> to vector<32x32xf32>
    %cst_105 = arith.constant dense<0.000000e+00> : vector<8x32xf32>
    %119 = tpu.matmul %93, %118, %cst_105 {dimension_numbers = #tpu.dot_dimension_numbers<[1], [0], [0], [1], [0, 0, 1, 1], [], []>} : vector<8x32xf32>, vector<32x32xf32>, vector<8x32xf32> -> vector<8x32xf32>
    %c1_106 = arith.constant 1 : index
    %c1_107 = arith.constant 1 : index
    %c0_108 = arith.constant 0 : index
    %c0_109 = arith.constant 0 : index
    %120 = vector.load %arg2[%c1_106, %c1_107, %c0_108, %c0_109] : memref<3x4x32x32xf32, #tpu.memory_space<vmem>>, vector<1x1x32x32xf32>
    %121 = vector.shape_cast %120 : vector<1x1x32x32xf32> to vector<32x32xf32>
    %cst_110 = arith.constant dense<0.000000e+00> : vector<8x32xf32>
    %122 = tpu.matmul %93, %121, %cst_110 {dimension_numbers = #tpu.dot_dimension_numbers<[1], [0], [0], [1], [0, 0, 1, 1], [], []>} : vector<8x32xf32>, vector<32x32xf32>, vector<8x32xf32> -> vector<8x32xf32>
    %cst_111 = arith.constant dense<0.000000e+00> : vector<8x8xf32>
    %123 = tpu.matmul %119, %122, %cst_111 {dimension_numbers = #tpu.dot_dimension_numbers<[1], [1], [0], [0], [0, 0, 1, 0], [], []>} : vector<8x32xf32>, vector<8x32xf32>, vector<8x8xf32> -> vector<8x8xf32>
    %cst_112 = arith.constant dense<0xFF800000> : vector<8xf32>
    %124 = vector.multi_reduction <maximumf>, %123, %cst_112 [1] : vector<8x8xf32> to vector<8xf32>
    %125 = vector.shape_cast %124 : vector<8xf32> to vector<8x1xf32>
    %126 = vector.broadcast %125 : vector<8x1xf32> to vector<8x8xf32>
    %127 = arith.subf %123, %126 : vector<8x8xf32>
    %128 = math.exp %127 : vector<8x8xf32>
    %cst_113 = arith.constant dense<0.000000e+00> : vector<8xf32>
    %129 = vector.multi_reduction <add>, %128, %cst_113 [1] : vector<8x8xf32> to vector<8xf32>
    %130 = vector.shape_cast %129 : vector<8xf32> to vector<8x1xf32>
    %131 = vector.broadcast %130 : vector<8x1xf32> to vector<8x8xf32>
    %132 = arith.divf %128, %131 : vector<8x8xf32>
    %c2_114 = arith.constant 2 : index
    %c1_115 = arith.constant 1 : index
    %c0_116 = arith.constant 0 : index
    %c0_117 = arith.constant 0 : index
    %133 = vector.load %arg2[%c2_114, %c1_115, %c0_116, %c0_117] : memref<3x4x32x32xf32, #tpu.memory_space<vmem>>, vector<1x1x32x32xf32>
    %134 = vector.shape_cast %133 : vector<1x1x32x32xf32> to vector<32x32xf32>
    %cst_118 = arith.constant dense<0.000000e+00> : vector<8x32xf32>
    %135 = tpu.matmul %93, %134, %cst_118 {dimension_numbers = #tpu.dot_dimension_numbers<[1], [0], [0], [1], [0, 0, 1, 1], [], []>} : vector<8x32xf32>, vector<32x32xf32>, vector<8x32xf32> -> vector<8x32xf32>
    %cst_119 = arith.constant dense<0.000000e+00> : vector<8x32xf32>
    %136 = tpu.matmul %132, %135, %cst_119 {dimension_numbers = #tpu.dot_dimension_numbers<[1], [0], [0], [1], [0, 0, 1, 1], [], []>} : vector<8x8xf32>, vector<8x32xf32>, vector<8x32xf32> -> vector<8x32xf32>
    %137 = arith.addf %116, %136 : vector<8x32xf32>
    %c0_120 = arith.constant 0 : index
    %c2_121 = arith.constant 2 : index
    %c0_122 = arith.constant 0 : index
    %c0_123 = arith.constant 0 : index
    %138 = vector.load %arg2[%c0_120, %c2_121, %c0_122, %c0_123] : memref<3x4x32x32xf32, #tpu.memory_space<vmem>>, vector<1x1x32x32xf32>
    %139 = vector.shape_cast %138 : vector<1x1x32x32xf32> to vector<32x32xf32>
    %cst_124 = arith.constant dense<0.000000e+00> : vector<8x32xf32>
    %140 = tpu.matmul %93, %139, %cst_124 {dimension_numbers = #tpu.dot_dimension_numbers<[1], [0], [0], [1], [0, 0, 1, 1], [], []>} : vector<8x32xf32>, vector<32x32xf32>, vector<8x32xf32> -> vector<8x32xf32>
    %c1_125 = arith.constant 1 : index
    %c2_126 = arith.constant 2 : index
    %c0_127 = arith.constant 0 : index
    %c0_128 = arith.constant 0 : index
    %141 = vector.load %arg2[%c1_125, %c2_126, %c0_127, %c0_128] : memref<3x4x32x32xf32, #tpu.memory_space<vmem>>, vector<1x1x32x32xf32>
    %142 = vector.shape_cast %141 : vector<1x1x32x32xf32> to vector<32x32xf32>
    %cst_129 = arith.constant dense<0.000000e+00> : vector<8x32xf32>
    %143 = tpu.matmul %93, %142, %cst_129 {dimension_numbers = #tpu.dot_dimension_numbers<[1], [0], [0], [1], [0, 0, 1, 1], [], []>} : vector<8x32xf32>, vector<32x32xf32>, vector<8x32xf32> -> vector<8x32xf32>
    %cst_130 = arith.constant dense<0.000000e+00> : vector<8x8xf32>
    %144 = tpu.matmul %140, %143, %cst_130 {dimension_numbers = #tpu.dot_dimension_numbers<[1], [1], [0], [0], [0, 0, 1, 0], [], []>} : vector<8x32xf32>, vector<8x32xf32>, vector<8x8xf32> -> vector<8x8xf32>
    %cst_131 = arith.constant dense<0xFF800000> : vector<8xf32>
    %145 = vector.multi_reduction <maximumf>, %144, %cst_131 [1] : vector<8x8xf32> to vector<8xf32>
    %146 = vector.shape_cast %145 : vector<8xf32> to vector<8x1xf32>
    %147 = vector.broadcast %146 : vector<8x1xf32> to vector<8x8xf32>
    %148 = arith.subf %144, %147 : vector<8x8xf32>
    %149 = math.exp %148 : vector<8x8xf32>
    %cst_132 = arith.constant dense<0.000000e+00> : vector<8xf32>
    %150 = vector.multi_reduction <add>, %149, %cst_132 [1] : vector<8x8xf32> to vector<8xf32>
    %151 = vector.shape_cast %150 : vector<8xf32> to vector<8x1xf32>
    %152 = vector.broadcast %151 : vector<8x1xf32> to vector<8x8xf32>
    %153 = arith.divf %149, %152 : vector<8x8xf32>
    %c2_133 = arith.constant 2 : index
    %c2_134 = arith.constant 2 : index
    %c0_135 = arith.constant 0 : index
    %c0_136 = arith.constant 0 : index
    %154 = vector.load %arg2[%c2_133, %c2_134, %c0_135, %c0_136] : memref<3x4x32x32xf32, #tpu.memory_space<vmem>>, vector<1x1x32x32xf32>
    %155 = vector.shape_cast %154 : vector<1x1x32x32xf32> to vector<32x32xf32>
    %cst_137 = arith.constant dense<0.000000e+00> : vector<8x32xf32>
    %156 = tpu.matmul %93, %155, %cst_137 {dimension_numbers = #tpu.dot_dimension_numbers<[1], [0], [0], [1], [0, 0, 1, 1], [], []>} : vector<8x32xf32>, vector<32x32xf32>, vector<8x32xf32> -> vector<8x32xf32>
    %cst_138 = arith.constant dense<0.000000e+00> : vector<8x32xf32>
    %157 = tpu.matmul %153, %156, %cst_138 {dimension_numbers = #tpu.dot_dimension_numbers<[1], [0], [0], [1], [0, 0, 1, 1], [], []>} : vector<8x8xf32>, vector<8x32xf32>, vector<8x32xf32> -> vector<8x32xf32>
    %158 = arith.addf %137, %157 : vector<8x32xf32>
    %c0_139 = arith.constant 0 : index
    %c3_140 = arith.constant 3 : index
    %c0_141 = arith.constant 0 : index
    %c0_142 = arith.constant 0 : index
    %159 = vector.load %arg2[%c0_139, %c3_140, %c0_141, %c0_142] : memref<3x4x32x32xf32, #tpu.memory_space<vmem>>, vector<1x1x32x32xf32>
    %160 = vector.shape_cast %159 : vector<1x1x32x32xf32> to vector<32x32xf32>
    %cst_143 = arith.constant dense<0.000000e+00> : vector<8x32xf32>
    %161 = tpu.matmul %93, %160, %cst_143 {dimension_numbers = #tpu.dot_dimension_numbers<[1], [0], [0], [1], [0, 0, 1, 1], [], []>} : vector<8x32xf32>, vector<32x32xf32>, vector<8x32xf32> -> vector<8x32xf32>
    %c1_144 = arith.constant 1 : index
    %c3_145 = arith.constant 3 : index
    %c0_146 = arith.constant 0 : index
    %c0_147 = arith.constant 0 : index
    %162 = vector.load %arg2[%c1_144, %c3_145, %c0_146, %c0_147] : memref<3x4x32x32xf32, #tpu.memory_space<vmem>>, vector<1x1x32x32xf32>
    %163 = vector.shape_cast %162 : vector<1x1x32x32xf32> to vector<32x32xf32>
    %cst_148 = arith.constant dense<0.000000e+00> : vector<8x32xf32>
    %164 = tpu.matmul %93, %163, %cst_148 {dimension_numbers = #tpu.dot_dimension_numbers<[1], [0], [0], [1], [0, 0, 1, 1], [], []>} : vector<8x32xf32>, vector<32x32xf32>, vector<8x32xf32> -> vector<8x32xf32>
    %cst_149 = arith.constant dense<0.000000e+00> : vector<8x8xf32>
    %165 = tpu.matmul %161, %164, %cst_149 {dimension_numbers = #tpu.dot_dimension_numbers<[1], [1], [0], [0], [0, 0, 1, 0], [], []>} : vector<8x32xf32>, vector<8x32xf32>, vector<8x8xf32> -> vector<8x8xf32>
    %cst_150 = arith.constant dense<0xFF800000> : vector<8xf32>
    %166 = vector.multi_reduction <maximumf>, %165, %cst_150 [1] : vector<8x8xf32> to vector<8xf32>
    %167 = vector.shape_cast %166 : vector<8xf32> to vector<8x1xf32>
    %168 = vector.broadcast %167 : vector<8x1xf32> to vector<8x8xf32>
    %169 = arith.subf %165, %168 : vector<8x8xf32>
    %170 = math.exp %169 : vector<8x8xf32>
    %cst_151 = arith.constant dense<0.000000e+00> : vector<8xf32>
    %171 = vector.multi_reduction <add>, %170, %cst_151 [1] : vector<8x8xf32> to vector<8xf32>
    %172 = vector.shape_cast %171 : vector<8xf32> to vector<8x1xf32>
    %173 = vector.broadcast %172 : vector<8x1xf32> to vector<8x8xf32>
    %174 = arith.divf %170, %173 : vector<8x8xf32>
    %c2_152 = arith.constant 2 : index
    %c3_153 = arith.constant 3 : index
    %c0_154 = arith.constant 0 : index
    %c0_155 = arith.constant 0 : index
    %175 = vector.load %arg2[%c2_152, %c3_153, %c0_154, %c0_155] : memref<3x4x32x32xf32, #tpu.memory_space<vmem>>, vector<1x1x32x32xf32>
    %176 = vector.shape_cast %175 : vector<1x1x32x32xf32> to vector<32x32xf32>
    %cst_156 = arith.constant dense<0.000000e+00> : vector<8x32xf32>
    %177 = tpu.matmul %93, %176, %cst_156 {dimension_numbers = #tpu.dot_dimension_numbers<[1], [0], [0], [1], [0, 0, 1, 1], [], []>} : vector<8x32xf32>, vector<32x32xf32>, vector<8x32xf32> -> vector<8x32xf32>
    %cst_157 = arith.constant dense<0.000000e+00> : vector<8x32xf32>
    %178 = tpu.matmul %174, %177, %cst_157 {dimension_numbers = #tpu.dot_dimension_numbers<[1], [0], [0], [1], [0, 0, 1, 1], [], []>} : vector<8x8xf32>, vector<8x32xf32>, vector<8x32xf32> -> vector<8x32xf32>
    %179 = arith.addf %158, %178 : vector<8x32xf32>
    %c1_158 = arith.constant 1 : index
    %c0_159 = arith.constant 0 : index
    %c0_160 = arith.constant 0 : index
    %180 = vector.load %arg4[%c1_158, %c0_159, %c0_160] : memref<2x8x32xf32, #tpu.memory_space<vmem>>, vector<1x8x32xf32>
    %181 = vector.shape_cast %180 : vector<1x8x32xf32> to vector<8x32xf32>
    %182 = vector.shape_cast %179 : vector<8x32xf32> to vector<1x8x32xf32>
    tpu.vector_store %arg4[%c1_158, %c0_159, %c0_160], %182 {strides = array<i32>} : memref<2x8x32xf32, #tpu.memory_space<vmem>>, vector<1x8x32xf32>,
    return
  }
  func.func @transform_0(%arg0: i32) -> (i32, i32, i32) {
    %c0_i32 = arith.constant 0 : i32
    %c0_i32_0 = arith.constant 0 : i32
    %c0_i32_1 = arith.constant 0 : i32
    %c0_i32_2 = arith.constant 0 : i32
    return %c0_i32, %c0_i32_0, %c0_i32_1 : i32, i32, i32
  }
  func.func @transform_1(%arg0: i32) -> (i32, i32, i32, i32) {
    %c0_i32 = arith.constant 0 : i32
    %c0_i32_0 = arith.constant 0 : i32
    %c0_i32_1 = arith.constant 0 : i32
    %c0_i32_2 = arith.constant 0 : i32
    %c0_i32_3 = arith.constant 0 : i32
    return %c0_i32, %c0_i32_0, %c0_i32_1, %c0_i32_2 : i32, i32, i32, i32
  }
  func.func @transform_2(%arg0: i32) -> (i32, i32) {
    %c0_i32 = arith.constant 0 : i32
    %c0_i32_0 = arith.constant 0 : i32
    %c0_i32_1 = arith.constant 0 : i32
    return %c0_i32, %c0_i32_0 : i32, i32
  }
  func.func @transform_3(%arg0: i32) -> (i32, i32, i32) {
    %c0_i32 = arith.constant 0 : i32
    %c0_i32_0 = arith.constant 0 : i32
    %c0_i32_1 = arith.constant 0 : i32
    %c0_i32_2 = arith.constant 0 : i32
    return %c0_i32, %c0_i32_0, %c0_i32_1 : i32, i32, i32
  }
}

</mosaic_0001>

<bundles_post_ra>
// kernel: tpu_custom_call.1
= control target key start
LH: loop header
LB: loop body
LE: loop exit
PB: predicated region body
PF: predicated region fallthrough
CT: control target
= control target key end

     0   :  { %8 = vsyncpa [#allocation3], 0  ;;  %s1771_s0 = inlined_call_operand.hbm [shape: f32[2,8,32], index: 0, kind: input, shape index: {}]   ;;  %s1772_s1 = inlined_call_operand.hbm [shape: f32[3,4,32,32], index: 1, kind: input, shape index: {}]   ;;  %s1773_s2 = inlined_call_operand.vmem [shape: f32[1,32], index: 2, kind: input, shape index: {}]   ;;  %s1774_s3 = inlined_call_operand.hbm [shape: f32[2,8,32], index: 3, kind: output, shape index: {}]  }
   0x1   :  { %9 = vsyncpa [#allocation6], 0 }
   0x2   :  { %10 = vsyncpa [#allocation4], 0  ;;  %s15_s14 = sshll.u32 %s1771_s0, 4  ;;  %s1428_s15 = smov [#allocation2]   ;;  %s16_s14 = int_to_ptr.hbm [resolvable:$true] %s15_s14 }
   0x3   :  { %s17_s16 = sshll.u32 %s1428_s15, 4  ;;  %s28_s19 = sshll.u32 %s1772_s1, 4  ;;  %s18_s16 = int_to_ptr.vmem [resolvable:$true] %s17_s16  ;;  %s29_s19 = int_to_ptr.hbm [resolvable:$true] %s28_s19 }
   0x4   :  { %s1429_s20 = smov 128   ;;  %s1430_s21 = smov 8  }
   0x5   :  { %23 = dma.hbm_to_vmem [thread:$0]  %s16_s14, 256, %s18_s16, [#allocation3], %s1429_s20, %s1429_s20, %s1430_s21  }
   0x6   :  { %s1431_s22 = smov [#allocation5]  }
   0x7   :  { %s30_s23 = sshll.u32 %s1431_s22, 4  ;;  %s31_s23 = int_to_ptr.vmem [resolvable:$true] %s30_s23 }
   0x8   :  { %36 = dma.hbm_to_vmem [thread:$0]  %s29_s19, 6144, %s31_s23, [#allocation6], %s1429_s20, %s1429_s20, %s1430_s21  }
   0x9   :  { %1422 = dma.done.wait [#allocation3], 256  }
   0xa   :  { %1423 = vsyncadd [#allocation3], 4294967040 }
   0xb   :  { %1424 = dma.done.wait [#allocation6], 6144  }
   0xc   :  { %1425 = vsyncadd [#allocation6], 4294961152  ;;  %v1465_v0 = vld [vmem:[#allocation5 + $0x98] sm:$0xff]  ;;  %v1467_v1 = vld [vmem:[#allocation5 + $0x90] sm:$0xff]  ;;  %vm56_vm0 = vcmask 261120   ;;  %vm131_vm1 = vcmask 64512  }
   0xd   :  { %v1469_v2 = vld [vmem:[#allocation5 + $0x18] sm:$0xff]  ;;  %97 = vmatpush.msra.mxu1 %v1465_v0  ;;  %v1473_v3 = vld [vmem:[#allocation5 + $0x10] sm:$0xff]  ;;  %v1475_v4 = vld [vmem:[#allocation5 + $0x88] sm:$0xff]  ;;  %s1250_s27 = sshll.u32 %s1774_s3, 4  ;;  %s1251_s27 = int_to_ptr.hbm [resolvable:$true] %s1250_s27 }
   0xe   :  { %72 = vmatpush.msra.mxu0 %v1469_v2  ;;  %v1477_v5 = vld [vmem:[#allocation5 + $0x8] sm:$0xff]  ;;  %v1481_v6 = vld [vmem:[#allocation5 + $0x80] sm:$0xff]  ;;  %v1487_v8 = vld [vmem:[#allocation2] sm:$0xff] }
   0xf   :  { %98 = vmatpush.msra.mxu1 %v1467_v1  ;;  %v1483_v7 = vld [vmem:[#allocation5] sm:$0xff]  ;;  %v1489_v9 = vld [vmem:[#allocation5 + $0x118] sm:$0xff]  ;;  %v1498_v12 = vld [vmem:[#allocation5 + $0x110] sm:$0xff] }
  0x10   :  { %73 = vmatpush.msra.mxu0 %v1473_v3  ;;  %v1491_v10 = vld [vmem:[#allocation5 + $0xb8] sm:$0xff]  ;;  %173 = vmatpush.msra.mxu3 %v1489_v9  ;;  %v1504_v13 = vld [vmem:[#allocation5 + $0xb0] sm:$0xff]  ;;  %v1510_v15 = vld [vmem:[#allocation5 + $0xa8] sm:$0xff] }
  0x11   :  { %99 = vmatpush.msra.mxu1 %v1475_v4  ;;  %v1493_v11 = vld [vmem:[#allocation5 + $0x38] sm:$0xff]  ;;  %v1506_v14 = vld [vmem:[#allocation5 + $0x30] sm:$0xff]  ;;  %v1512_v16 = vld [vmem:[#allocation5 + $0x28] sm:$0xff] }
  0x12   :  { %74 = vmatpush.msra.mxu0 %v1477_v5  ;;  %174 = vmatpush.msra.mxu3 %v1498_v12  ;;  %v1517_v17 = vld [vmem:[#allocation5 + $0xa0] sm:$0xff]  ;;  %v1529_v19 = vld [vmem:[#allocation5 + $0x108] sm:$0xff]  ;;  %v1543_v30 = vld [vmem:[#allocation5 + $0xd8] sm:$0xff] }
  0x13   :  { %100 = vmatpush.msra.mxu1 %v1481_v6  ;;  %v1519_v18 = vld [vmem:[#allocation5 + $0x20] sm:$0xff]  ;;  %v1545_v31 = vld [vmem:[#allocation5 + $0xd0] sm:$0xff]  ;;  %v1548_v32 = vld [vmem:[#allocation5 + $0x58] sm:$0xff] }
  0x14   :  { %75 = vmatpush.msra.mxu0 %v1483_v7  ;;  %1265 = vmatmul.msk.f32.vlgmr.msra.gmra.mxu1 %vm56_vm0, %v1487_v8  ;;  %v1532_v20 = vld [vmem:[#allocation5 + $0x100] sm:$0xff]  ;;  %v1550_v33 = vld [vmem:[#allocation5 + $0x50] sm:$0xff]  ;;  %v1552_v34 = vld [vmem:[#allocation5 + $0xc8] sm:$0xff] }
  0x15   :  { %1264 = vmatmul.msk.f32.vlgmr.msra.gmra.mxu0 %vm56_vm0, %v1487_v8  ;;  %247 = vmatpush.msrb.mxu1 %v1491_v10  ;;  %v1556_v35 = vld [vmem:[#allocation5 + $0x48] sm:$0xff]  ;;  %v1558_v36 = vld [vmem:[#allocation5 + $0xc0] sm:$0xff]  ;;  %v1576_v48 = vld [vmem:[#allocation5 + $0x138] sm:$0xff] }
  0x16   :  { %222 = vmatpush.msrb.mxu0 %v1493_v11  ;;  %175 = vmatpush.msra.mxu3 %v1529_v19  ;;  %v1562_v37 = vld [vmem:[#allocation5 + $0x40] sm:$0xff]  ;;  %v1579_v49 = vld [vmem:[#allocation5 + $0x130] sm:$0xff]  ;;  %v1582_v50 = vld [vmem:[#allocation5 + $0x128] sm:$0xff] }
  0x17   :  { %248 = vmatpush.msrb.mxu1 %v1504_v13  ;;  %v1585_v51 = vld [vmem:[#allocation5 + $0x120] sm:$0xff]  ;;  %v1588_v53 = vld [vmem:[#allocation5 + $0x78] sm:$0xff]  ;;  %v1591_v54 = vld [vmem:[#allocation5 + $0x70] sm:$0xff] }
  0x18   :  { %223 = vmatpush.msrb.mxu0 %v1506_v14  ;;  %176 = vmatpush.msra.mxu3 %v1532_v20  ;;  %v1593_v55 = vld [vmem:[#allocation5 + $0x68] sm:$0xff]  ;;  %v1597_v62 = vld [vmem:[#allocation5 + $0x60] sm:$0xff] }
  0x19   :  { %249 = vmatpush.msrb.mxu1 %v1510_v15  ;;  %1268 = vmatmul.msk.f32.vlgmr.msra.gmra.mxu3 %vm56_vm0, %v1487_v8 }
  0x1a   :  { %224 = vmatpush.msrb.mxu0 %v1512_v16 }
  0x1b   :  { %250 = vmatpush.msrb.mxu1 %v1517_v17 }
  0x1c   :  { %225 = vmatpush.msrb.mxu0 %v1519_v18  ;;  %1271 = vmatmul.msk.f32.vlgmr.msrb.gmra.mxu1 %vm56_vm0, %v1487_v8 }
  0x1d   :  { %1270 = vmatmul.msk.f32.vlgmr.msrb.gmra.mxu0 %vm56_vm0, %v1487_v8  ;;  %371 = vmatpush.msra.mxu1 %v1548_v32 }
  0x1f   :  { %372 = vmatpush.msra.mxu1 %v1550_v33 }
  0x21   :  { %373 = vmatpush.msra.mxu1 %v1556_v35 }
  0x23   :  { %374 = vmatpush.msra.mxu1 %v1562_v37 }
  0x24   :  { %1276 = vmatmul.msk.f32.vlgmr.msra.gmra.mxu1 %vm56_vm0, %v1487_v8 }
  0x91   :  { %v102_v21 = vpop.f32.mrf.mxu1 }
  0x92   :  { %v77_v22 = vpop.f32.mrf.mxu0  ;;  %1266 = vmatpush.xpose.msk.msra.mxu2 %vm56_vm0, %v102_v21 }
  0x95   :  { %1267 = vmatmul.msk.f32.vlgmr.msra.gmra.mxu2 %vm56_vm0, %v77_v22 }
  0x99   :  { %v252_v23 = vpop.f32.mrf.mxu1 }
  0x9a   :  { %1272 = vmatpush.xpose.msk.msrb.mxu3 %vm56_vm0, %v252_v23  ;;  %v227_v24 = vpop.f32.mrf.mxu0 }
  0x9c   :  { %v178_v25 = vpop.f32.mrf.mxu3 }
  0x9d   :  { %1273 = vmatmul.msk.f32.vlgmr.msrb.gmra.mxu3 %vm56_vm0, %v227_v24  ;;  %199 = vmatpush.msrb.mxu2 %v178_v25 }
  0x9e   :  { %396 = vmatpush.msra.mxu3 %v1543_v30 }
  0x9f   :  { %322 = vmatpush.msra.mxu2 %v1576_v48 }
  0xa0   :  { %397 = vmatpush.msra.mxu3 %v1545_v31 }
  0xa1   :  { %323 = vmatpush.msra.mxu2 %v1579_v49 }
  0xa2   :  { %398 = vmatpush.msra.mxu3 %v1552_v34 }
  0xa3   :  { %324 = vmatpush.msra.mxu2 %v1582_v50 }
  0xa4   :  { %399 = vmatpush.msra.mxu3 %v1558_v36 }
  0xa5   :  { %1277 = vmatmul.msk.f32.vlgmr.msra.gmra.mxu3 %vm56_vm0, %v1487_v8  ;;  %325 = vmatpush.msra.mxu2 %v1585_v51 }
  0xa6   :  { %520 = vmatpush.msrb.mxu3 %v1588_v53 }
  0xa8   :  { %521 = vmatpush.msrb.mxu3 %v1591_v54 }
  0xaa   :  { %522 = vmatpush.msrb.mxu3 %v1593_v55 }
  0xac   :  { %523 = vmatpush.msrb.mxu3 %v1597_v62 }
  0xad   :  { %1282 = vmatmul.msk.f32.vlgmr.msrb.gmra.mxu3 %vm56_vm0, %v1487_v8 }
 0x118   :  { %v128_v26 = vpop.f32.mrf.mxu2 }
 0x119   :  { %v132_v27 = vsel %vm131_vm1, %v128_v26, -inf }
 0x11a   :  { %133 = vmax.xlane.f32.xlu0 %v132_v27  ;;  %v1608_v27 = vld [vmem:[#allocation5 + $0xf0] sm:$0xff] }
 0x120   :  { %v278_v28 = vpop.f32.mrf.mxu3 }
 0x121   :  { %v281_v29 = vsel %vm131_vm1, %v278_v28, -inf }
 0x122   :  { %282 = vmax.xlane.f32.xlu1 %v281_v29  ;;  %v1614_v29 = vld [vmem:[#allocation5 + $0xe0] sm:$0xff] }
 0x128   :  { %v401_v25 = vpop.f32.mrf.mxu3 }
 0x18d   :  { %v134_v38 = vpop.xlane.xlu0 %133 }
 0x18e   :  { %v135_v39 = vsub.f32 %v128_v26, %v134_v38  ;;  %v1604_v26 = vld [vmem:[#allocation5 + $0xf8] sm:$0xff]  ;;  %v376_v38 = vpop.f32.mrf.mxu1 }
 0x190   :  { %v136_v40 = vmul.f32 1.442695, %v135_v39 }
 0x192   :  { %1318 = vpow2.f32 %v136_v40 }
 0x195   :  { %v283_v41 = vpop.xlane.xlu1 %282 }
 0x196   :  { %v284_v42 = vsub.f32 %v278_v28, %v283_v41  ;;  %v1611_v28 = vld [vmem:[#allocation5 + $0xe8] sm:$0xff] }
 0x198   :  { %v1319_v43 = vpop.eup %1318  ;;  %v285_v44 = vmul.f32 1.442695, %v284_v42 }
 0x199   :  { %v138_v45 = vsel %vm131_vm1, %v1319_v43, 0.0 }
 0x19a   :  { %1320 = vpow2.f32 %v285_v44  ;;  %139 = vadd.xlane.f32.xlu0 %v138_v45 }
 0x1a0   :  { %v1572_v46 = vpop.eup %1320 }
 0x1a1   :  { %v287_v47 = vsel %vm131_vm1, %v1572_v46, 0.0 }
 0x1a2   :  { %288 = vadd.xlane.f32.xlu1 %v287_v47 }
 0x20d   :  { %v140_v52 = vpop.xlane.xlu0 %139 }
 0x20e   :  { %1322 = vrcp.f32 %v140_v52  ;;  %v152_v59 = vand.u32 2147483648, %v140_v52  ;;  %v150_v61 = vand.u32 2147483647, %v140_v52  ;;  %vm146_vm3 = vweird.f32 %v140_v52 }
 0x210   :  { %v153_v21 = vor.u32 1.1754944e-38, %v152_v59  ;;  %vm151_vm5 = vcmp.eq.f32.partialorder %v150_v61, 8.507059e+37  ;;  %v1632_v59 = vld [vmem:[#allocation5 + $0x148] sm:$0xff] }
 0x214   :  { %v1323_v56 = vpop.eup %1322 }
 0x215   :  { %v142_v57 = vmul.f32 %v1323_v56, %v140_v52  ;;  %vm147_vm2 = vweird.f32 %v1323_v56  ;;  %v289_v39 = vpop.xlane.xlu1 %288 }
 0x216   :  { %vm148_vm4 = vmor %vm146_vm3, %vm147_vm2  ;;  %1324 = vrcp.f32 %v289_v39  ;;  %vm295_vm6 = vweird.f32 %v289_v39  ;;  %v301_v44 = vand.u32 2147483648, %v289_v39 }
 0x217   :  { %v143_v58 = vsub.f32 1.0, %v142_v57  ;;  %v1626_v57 = vld [vmem:[#allocation5 + $0x158] sm:$0xff] }
 0x218   :  { %v302_v47 = vor.u32 1.1754944e-38, %v301_v44 }
 0x219   :  { %v144_v60 = vmul.f32 %v1323_v56, %v143_v58  ;;  %v1629_v58 = vld [vmem:[#allocation5 + $0x150] sm:$0xff] }
 0x21b   :  { %v145_v63 = vadd.f32 %v1323_v56, %v144_v60  ;;  %v1635_v60 = vld [vmem:[#allocation5 + $0x140] sm:$0xff] }
 0x21c   :  { %v1325_v40 = vpop.eup %1324 }
 0x21d   :  { %v149_v22 = vsel %vm148_vm4, %v1323_v56, %v145_v63  ;;  %v291_v41 = vmul.f32 %v1325_v40, %v289_v39  ;;  %vm296_vm7 = vweird.f32 %v1325_v40 }
 0x21e   :  { %v154_v23 = vsel %vm151_vm5, %v153_v21, %v149_v22  ;;  %vm297_vm8 = vmor %vm295_vm6, %vm296_vm7  ;;  %v525_v21 = vpop.f32.mrf.mxu3  ;;  %v1652_v22 = vld [vmem:[#allocation2 + $0x8] sm:$0xff] }
 0x21f   :  { %v155_v24 = vmul.f32 %v1319_v43, %v154_v23  ;;  %v292_v42 = vsub.f32 1.0, %v291_v41  ;;  %v1675_v41 = vld [vmem:[#allocation5 + $0x168] sm:$0xff] }
 0x221   :  { %1269 = vmatmul.msk.f32.vlgmr.msrb.gmra.mxu2 %vm131_vm1, %v155_v24  ;;  %v293_v43 = vmul.f32 %v1325_v40, %v292_v42  ;;  %v1678_v42 = vld [vmem:[#allocation5 + $0x160] sm:$0xff] }
 0x222   :  { %1278 = vmatpush.xpose.msk.msrb.mxu2 %vm56_vm0, %v401_v25 }
 0x223   :  { %v294_v45 = vadd.f32 %v1325_v40, %v293_v43 }
 0x229   :  { %1274 = vmatmul.msk.f32.vlgmr.msra.gmra.mxu2 %vm56_vm0, %v1487_v8 }
 0x22a   :  { %545 = vmatpush.msra.mxu2 %v1604_v26 }
 0x22c   :  { %546 = vmatpush.msra.mxu2 %v1608_v27 }
 0x22e   :  { %547 = vmatpush.msra.mxu2 %v1611_v28 }
 0x230   :  { %548 = vmatpush.msra.mxu2 %v1614_v29 }
 0x231   :  { %1279 = vmatmul.msk.f32.vlgmr.msrb.gmra.mxu2 %vm56_vm0, %v376_v38 }
 0x232   :  { %674 = vmatpush.msrb.mxu2 %v1469_v2  ;;  %v299_v2 = vand.u32 2147483647, %v289_v39  ;;  %v1670_v39 = vld [vmem:[#allocation5 + $0x178] sm:$0xff] }
 0x234   :  { %675 = vmatpush.msrb.mxu2 %v1473_v3  ;;  %vm300_vm9 = vcmp.eq.f32.partialorder %v299_v2, 8.507059e+37 }
 0x236   :  { %676 = vmatpush.msrb.mxu2 %v1477_v5  ;;  %v298_v5 = vsel %vm297_vm8, %v1325_v40, %v294_v45  ;;  %v1673_v40 = vld [vmem:[#allocation5 + $0x170] sm:$0xff] }
 0x238   :  { %677 = vmatpush.msrb.mxu2 %v1483_v7  ;;  %v303_v7 = vsel %vm300_vm9, %v302_v47, %v298_v5 }
 0x239   :  { %1283 = vmatmul.msk.f32.vlgmr.msra.gmra.mxu2 %vm56_vm0, %v1487_v8  ;;  %v304_v56 = vmul.f32 %v1572_v46, %v303_v7 }
 0x241   :  { %1288 = vmatmul.msk.f32.vlgmr.msrb.gmra.mxu2 %vm56_vm0, %v1652_v22 }
 0x2a4   :  { %v201_v3 = vpop.f32.mrf.mxu2 }
 0x2ac   :  { %v327_v52 = vpop.f32.mrf.mxu2 }
 0x2ad   :  { %348 = vmatpush.msra.mxu0 %v327_v52 }
 0x2ae   :  { %1275 = vmatmul.msk.f32.vlgmr.msra.gmra.mxu0 %vm131_vm1, %v304_v56 }
 0x2af   :  { %471 = vmatpush.msrb.mxu0 %v1626_v57 }
 0x2b1   :  { %472 = vmatpush.msrb.mxu0 %v1629_v58 }
 0x2b3   :  { %473 = vmatpush.msrb.mxu0 %v1632_v59 }
 0x2b4   :  { %v427_v61 = vpop.f32.mrf.mxu2 }
 0x2b5   :  { %v430_v46 = vsel %vm131_vm1, %v427_v61, -inf  ;;  %474 = vmatpush.msrb.mxu0 %v1635_v60 }
 0x2b6   :  { %431 = vmax.xlane.f32.xlu2 %v430_v46  ;;  %1280 = vmatmul.msk.f32.vlgmr.msrb.gmra.mxu0 %vm56_vm0, %v1487_v8 }
 0x2bc   :  { %v550_v63 = vpop.f32.mrf.mxu2 }
 0x2bd   :  { %1284 = vmatpush.xpose.msk.msra.mxu0 %vm56_vm0, %v550_v63 }
 0x2c0   :  { %1285 = vmatmul.msk.f32.vlgmr.msra.gmra.mxu0 %vm56_vm0, %v525_v21 }
 0x2c1   :  { %698 = vmatpush.msrb.mxu0 %v1465_v0  ;;  %v1661_v0 = vld [vmem:[%s1773_s2] ss:$0 sm:$0xff]  ;;  %s1432_s2 = smov [#allocation7]  }
 0x2c2   :  { %s1248_s24 = sshll.u32 %s1432_s2, 4  ;;  %s1249_s24 = int_to_ptr.vmem [resolvable:$true] %s1248_s24 }
 0x2c3   :  { %699 = vmatpush.msrb.mxu0 %v1467_v1 }
 0x2c5   :  { %700 = vmatpush.msrb.mxu0 %v1475_v4  ;;  %v204_v4 = vadd.f32 %v1661_v0, %v201_v3 }
 0x2c7   :  { %701 = vmatpush.msrb.mxu0 %v1481_v6 }
 0x2c8   :  { %1289 = vmatmul.msk.f32.vlgmr.msrb.gmra.mxu0 %vm56_vm0, %v1652_v22 }
 0x2c9   :  { %820 = vmatpush.msra.mxu0 %v1493_v11 }
 0x2cb   :  { %821 = vmatpush.msra.mxu0 %v1506_v14 }
 0x2cd   :  { %822 = vmatpush.msra.mxu0 %v1512_v16 }
 0x2cf   :  { %823 = vmatpush.msra.mxu0 %v1519_v18 }
 0x2d0   :  { %1294 = vmatmul.msk.f32.vlgmr.msra.gmra.mxu0 %vm56_vm0, %v1652_v22 }
 0x329   :  { %v432_v1 = vpop.xlane.xlu2 %431 }
 0x32a   :  { %v433_v6 = vsub.f32 %v427_v61, %v432_v1 }
 0x32b   :  { %v350_v11 = vpop.f32.mrf.mxu0 }
 0x32c   :  { %v434_v14 = vmul.f32 1.442695, %v433_v6  ;;  %v1666_v16 = vadd.f32 %v350_v11, %v204_v4 }
 0x32e   :  { %1326 = vpow2.f32 %v434_v14  ;;  %v679_v14 = vpop.f32.mrf.mxu2 }
 0x333   :  { %v476_v18 = vpop.f32.mrf.mxu0 }
 0x334   :  { %v1327_v23 = vpop.eup %1326  ;;  %497 = vmatpush.msrb.mxu1 %v476_v18 }
 0x335   :  { %v436_v24 = vsel %vm131_vm1, %v1327_v23, 0.0 }
 0x336   :  { %437 = vadd.xlane.f32.xlu2 %v436_v24  ;;  %620 = vmatpush.msra.mxu1 %v1670_v39 }
 0x338   :  { %621 = vmatpush.msra.mxu1 %v1673_v40 }
 0x33a   :  { %622 = vmatpush.msra.mxu1 %v1675_v41 }
 0x33c   :  { %623 = vmatpush.msra.mxu1 %v1678_v42 }
 0x33d   :  { %v576_v25 = vpop.f32.mrf.mxu0 }
 0x33e   :  { %v579_v38 = vsel %vm131_vm1, %v576_v25, -inf }
 0x33f   :  { %580 = vmax.xlane.f32.xlu0 %v579_v38 }
 0x345   :  { %v703_v4 = vpop.f32.mrf.mxu0 }
 0x3a9   :  { %v438_v43 = vpop.xlane.xlu2 %437 }
 0x3aa   :  { %1328 = vrcp.f32 %v438_v43  ;;  %v450_v5 = vand.u32 2147483648, %v438_v43  ;;  %v448_v52 = vand.u32 2147483647, %v438_v43  ;;  %vm444_vm11 = vweird.f32 %v438_v43 }
 0x3ac   :  { %v451_v46 = vor.u32 1.1754944e-38, %v450_v5  ;;  %vm449_vm13 = vcmp.eq.f32.partialorder %v448_v52, 8.507059e+37 }
 0x3b0   :  { %v1329_v44 = vpop.eup %1328 }
 0x3b1   :  { %v440_v45 = vmul.f32 %v1329_v44, %v438_v43  ;;  %vm445_vm10 = vweird.f32 %v1329_v44 }
 0x3b2   :  { %v581_v2 = vpop.xlane.xlu0 %580  ;;  %vm446_vm12 = vmor %vm444_vm11, %vm445_vm10 }
 0x3b3   :  { %v441_v3 = vsub.f32 1.0, %v440_v45  ;;  %v582_v47 = vsub.f32 %v576_v25, %v581_v2  ;;  %v825_v2 = vpop.f32.mrf.mxu0 }
 0x3b5   :  { %v442_v7 = vmul.f32 %v1329_v44, %v441_v3  ;;  %v583_v56 = vmul.f32 1.442695, %v582_v47 }
 0x3b7   :  { %v443_v61 = vadd.f32 %v1329_v44, %v442_v7  ;;  %1330 = vpow2.f32 %v583_v56 }
 0x3b9   :  { %v447_v63 = vsel %vm446_vm12, %v1329_v44, %v443_v61 }
 0x3ba   :  { %v452_v21 = vsel %vm449_vm13, %v451_v46, %v447_v63 }
 0x3bb   :  { %v453_v1 = vmul.f32 %v1327_v23, %v452_v21 }
 0x3bd   :  { %v1331_v6 = vpop.eup %1330  ;;  %1281 = vmatmul.msk.f32.vlgmr.msrb.gmra.mxu1 %vm131_vm1, %v453_v1 }
 0x3be   :  { %v585_v11 = vsel %vm131_vm1, %v1331_v6, 0.0  ;;  %1290 = vmatpush.xpose.msk.msrb.mxu1 %vm56_vm0, %v703_v4 }
 0x3bf   :  { %586 = vadd.xlane.f32.xlu1 %v585_v11 }
 0x3c5   :  { %1286 = vmatmul.msk.f32.vlgmr.msra.gmra.mxu1 %vm56_vm0, %v1487_v8 }
 0x3c6   :  { %844 = vmatpush.msra.mxu1 %v1491_v10 }
 0x3c8   :  { %845 = vmatpush.msra.mxu1 %v1504_v13 }
 0x3ca   :  { %846 = vmatpush.msra.mxu1 %v1510_v15 }
 0x3cc   :  { %847 = vmatpush.msra.mxu1 %v1517_v17 }
 0x3cd   :  { %1291 = vmatmul.msk.f32.vlgmr.msrb.gmra.mxu1 %vm56_vm0, %v679_v14 }
 0x3ce   :  { %966 = vmatpush.msrb.mxu1 %v1548_v32 }
 0x3d0   :  { %967 = vmatpush.msrb.mxu1 %v1550_v33 }
 0x3d2   :  { %968 = vmatpush.msrb.mxu1 %v1556_v35 }
 0x3d4   :  { %969 = vmatpush.msrb.mxu1 %v1562_v37 }
 0x3d5   :  { %1295 = vmatmul.msk.f32.vlgmr.msra.gmra.mxu1 %vm56_vm0, %v1652_v22 }
 0x3dd   :  { %1300 = vmatmul.msk.f32.vlgmr.msrb.gmra.mxu1 %vm56_vm0, %v1652_v22 }
 0x432   :  { %v587_v8 = vpop.xlane.xlu1 %586 }
 0x433   :  { %1332 = vrcp.f32 %v587_v8  ;;  %v599_v18 = vand.u32 2147483648, %v587_v8  ;;  %v597_v35 = vand.u32 2147483647, %v587_v8  ;;  %vm593_vm15 = vweird.f32 %v587_v8 }
 0x435   :  { %v600_v37 = vor.u32 1.1754944e-38, %v599_v18  ;;  %vm598_vm3 = vcmp.eq.f32.partialorder %v597_v35, 8.507059e+37 }
 0x439   :  { %v1333_v10 = vpop.eup %1332 }
 0x43a   :  { %v589_v13 = vmul.f32 %v1333_v10, %v587_v8  ;;  %v499_v15 = vpop.f32.mrf.mxu1  ;;  %vm594_vm14 = vweird.f32 %v1333_v10 }
 0x43b   :  { %v502_v17 = vadd.f32 %v499_v15, %v1666_v16  ;;  %vm595_vm2 = vmor %vm593_vm15, %vm594_vm14 }
 0x43c   :  { %v590_v32 = vsub.f32 1.0, %v589_v13 }
 0x43e   :  { %v591_v33 = vmul.f32 %v1333_v10, %v590_v32 }
 0x440   :  { %v592_v23 = vadd.f32 %v1333_v10, %v591_v33 }
 0x442   :  { %v596_v24 = vsel %vm595_vm2, %v1333_v10, %v592_v23  ;;  %v625_v25 = vpop.f32.mrf.mxu1 }
 0x443   :  { %v601_v38 = vsel %vm598_vm3, %v600_v37, %v596_v24  ;;  %646 = vmatpush.msra.mxu3 %v625_v25 }
 0x444   :  { %v602_v43 = vmul.f32 %v1331_v6, %v601_v38 }
 0x445   :  { %772 = vmatpush.msrb.mxu3 %v1489_v9 }
 0x446   :  { %1287 = vmatmul.msk.f32.vlgmr.msra.gmra.mxu3 %vm131_vm1, %v602_v43 }
 0x447   :  { %773 = vmatpush.msrb.mxu3 %v1498_v12 }
 0x449   :  { %774 = vmatpush.msrb.mxu3 %v1529_v19 }
 0x44a   :  { %v729_v16 = vpop.f32.mrf.mxu1 }
 0x44b   :  { %v732_v44 = vsel %vm131_vm1, %v729_v16, -inf  ;;  %775 = vmatpush.msrb.mxu3 %v1532_v20 }
 0x44c   :  { %733 = vmax.xlane.f32.xlu2 %v732_v44 }
 0x44e   :  { %1292 = vmatmul.msk.f32.vlgmr.msrb.gmra.mxu3 %vm56_vm0, %v1652_v22 }
 0x452   :  { %v849_v45 = vpop.f32.mrf.mxu1 }
 0x453   :  { %1296 = vmatpush.xpose.msk.msra.mxu3 %vm56_vm0, %v849_v45 }
 0x456   :  { %1297 = vmatmul.msk.f32.vlgmr.msra.gmra.mxu3 %vm56_vm0, %v825_v2 }
 0x457   :  { %990 = vmatpush.msrb.mxu3 %v1543_v30 }
 0x459   :  { %991 = vmatpush.msrb.mxu3 %v1545_v31 }
 0x45a   :  { %v971_v6 = vpop.f32.mrf.mxu1 }
 0x45b   :  { %992 = vmatpush.msrb.mxu3 %v1552_v34 }
 0x45d   :  { %993 = vmatpush.msrb.mxu3 %v1558_v36 }
 0x45e   :  { %1301 = vmatmul.msk.f32.vlgmr.msrb.gmra.mxu3 %vm56_vm0, %v1652_v22 }
 0x45f   :  { %1112 = vmatpush.msra.mxu3 %v1588_v53 }
 0x461   :  { %1113 = vmatpush.msra.mxu3 %v1591_v54 }
 0x463   :  { %1114 = vmatpush.msra.mxu3 %v1593_v55 }
 0x465   :  { %1115 = vmatpush.msra.mxu3 %v1597_v62 }
 0x466   :  { %1306 = vmatmul.msk.f32.vlgmr.msra.gmra.mxu3 %vm56_vm0, %v1652_v22 }
 0x4bf   :  { %v734_v9 = vpop.xlane.xlu2 %733 }
 0x4c0   :  { %v735_v12 = vsub.f32 %v729_v16, %v734_v9 }
 0x4c2   :  { %v736_v19 = vmul.f32 1.442695, %v735_v12 }
 0x4c4   :  { %1334 = vpow2.f32 %v736_v19 }
 0x4c9   :  { %v648_v20 = vpop.f32.mrf.mxu3 }
 0x4ca   :  { %v1335_v30 = vpop.eup %1334  ;;  %v651_v31 = vadd.f32 %v648_v20, %v502_v17 }
 0x4cb   :  { %v738_v34 = vsel %vm131_vm1, %v1335_v30, 0.0 }
 0x4cc   :  { %652 = vst.msk [vmem:[#allocation7] sm:$0xff] %vm56_vm0, %v651_v31  ;;  %739 = vadd.xlane.f32.xlu0 %v738_v34 }
 0x4d1   :  { %v777_v36 = vpop.f32.mrf.mxu3 }
 0x4d2   :  { %798 = vmatpush.msra.mxu2 %v777_v36 }
 0x4d4   :  { %918 = vmatpush.msrb.mxu2 %v1576_v48 }
 0x4d6   :  { %919 = vmatpush.msrb.mxu2 %v1579_v49 }
 0x4d8   :  { %920 = vmatpush.msrb.mxu2 %v1582_v50 }
 0x4d9   :  { %v875_v53 = vpop.f32.mrf.mxu3 }
 0x4da   :  { %921 = vmatpush.msrb.mxu2 %v1585_v51  ;;  %v878_v54 = vsel %vm131_vm1, %v875_v53, -inf }
 0x4db   :  { %879 = vmax.xlane.f32.xlu1 %v878_v54 }
 0x4e1   :  { %v995_v21 = vpop.f32.mrf.mxu3 }
 0x4e9   :  { %v1117_v24 = vpop.f32.mrf.mxu3 }
 0x53f   :  { %v740_v55 = vpop.xlane.xlu0 %739 }
 0x540   :  { %1336 = vrcp.f32 %v740_v55  ;;  %v752_v5 = vand.u32 2147483648, %v740_v55  ;;  %v750_v52 = vand.u32 2147483647, %v740_v55  ;;  %vm746_vm5 = vweird.f32 %v740_v55 }
 0x542   :  { %v753_v49 = vor.u32 1.1754944e-38, %v752_v5  ;;  %vm751_vm7 = vcmp.eq.f32.partialorder %v750_v52, 8.507059e+37 }
 0x546   :  { %v1337_v62 = vpop.eup %1336 }
 0x547   :  { %v742_v3 = vmul.f32 %v1337_v62, %v740_v55  ;;  %vm747_vm4 = vweird.f32 %v1337_v62 }
 0x548   :  { %vm748_vm6 = vmor %vm746_vm5, %vm747_vm4 }
 0x549   :  { %v743_v47 = vsub.f32 1.0, %v742_v3 }
 0x54b   :  { %v744_v7 = vmul.f32 %v1337_v62, %v743_v47 }
 0x54d   :  { %v745_v48 = vadd.f32 %v1337_v62, %v744_v7 }
 0x54e   :  { %v880_v50 = vpop.xlane.xlu1 %879 }
 0x54f   :  { %v749_v56 = vsel %vm748_vm6, %v1337_v62, %v745_v48  ;;  %v881_v51 = vsub.f32 %v875_v53, %v880_v50 }
 0x550   :  { %v754_v61 = vsel %vm751_vm7, %v753_v49, %v749_v56 }
 0x551   :  { %v882_v46 = vmul.f32 1.442695, %v881_v51  ;;  %v755_v63 = vmul.f32 %v1335_v30, %v754_v61 }
 0x553   :  { %1338 = vpow2.f32 %v882_v46  ;;  %1293 = vmatmul.msk.f32.vlgmr.msra.gmra.mxu2 %vm131_vm1, %v755_v63 }
 0x554   :  { %1302 = vmatpush.xpose.msk.msra.mxu2 %vm56_vm0, %v995_v21 }
 0x559   :  { %v1339_v1 = vpop.eup %1338 }
 0x55a   :  { %v884_v4 = vsel %vm131_vm1, %v1339_v1, 0.0 }
 0x55b   :  { %885 = vadd.xlane.f32.xlu2 %v884_v4  ;;  %1298 = vmatmul.msk.f32.vlgmr.msrb.gmra.mxu2 %vm56_vm0, %v1652_v22 }
 0x55c   :  { %1136 = vmatpush.msrb.mxu2 %v1604_v26 }
 0x55e   :  { %1137 = vmatpush.msrb.mxu2 %v1608_v27 }
 0x560   :  { %1138 = vmatpush.msrb.mxu2 %v1611_v28 }
 0x562   :  { %1139 = vmatpush.msrb.mxu2 %v1614_v29 }
 0x563   :  { %1303 = vmatmul.msk.f32.vlgmr.msra.gmra.mxu2 %vm56_vm0, %v971_v6 }
 0x56b   :  { %1307 = vmatmul.msk.f32.vlgmr.msrb.gmra.mxu2 %vm56_vm0, %v1652_v22 }
 0x5ce   :  { %v886_v11 = vpop.xlane.xlu2 %885 }
 0x5cf   :  { %1340 = vrcp.f32 %v886_v11  ;;  %v898_v15 = vand.u32 2147483648, %v886_v11  ;;  %v896_v27 = vand.u32 2147483647, %v886_v11  ;;  %vm892_vm9 = vweird.f32 %v886_v11 }
 0x5d1   :  { %v899_v28 = vor.u32 1.1754944e-38, %v898_v15  ;;  %vm897_vm11 = vcmp.eq.f32.partialorder %v896_v27, 8.507059e+37 }
 0x5d5   :  { %v1341_v14 = vpop.eup %1340 }
 0x5d6   :  { %v888_v8 = vmul.f32 %v1341_v14, %v886_v11  ;;  %v800_v10 = vpop.f32.mrf.mxu2  ;;  %vm893_vm8 = vweird.f32 %v1341_v14 }
 0x5d7   :  { %vm894_vm10 = vmor %vm892_vm9, %vm893_vm8 }
 0x5d8   :  { %v889_v13 = vsub.f32 1.0, %v888_v8 }
 0x5da   :  { %v890_v26 = vmul.f32 %v1341_v14, %v889_v13 }
 0x5dc   :  { %v891_v17 = vadd.f32 %v1341_v14, %v890_v26 }
 0x5de   :  { %v895_v29 = vsel %vm894_vm10, %v1341_v14, %v891_v17  ;;  %v923_v32 = vpop.f32.mrf.mxu2 }
 0x5df   :  { %v900_v18 = vsel %vm897_vm11, %v899_v28, %v895_v29  ;;  %944 = vmatpush.msrb.mxu0 %v923_v32 }
 0x5e0   :  { %v901_v33 = vmul.f32 %v1339_v1, %v900_v18 }
 0x5e1   :  { %1064 = vmatpush.msra.mxu0 %v1626_v57 }
 0x5e2   :  { %1299 = vmatmul.msk.f32.vlgmr.msrb.gmra.mxu0 %vm131_vm1, %v901_v33 }
 0x5e3   :  { %1065 = vmatpush.msra.mxu0 %v1629_v58  ;;  %v803_v58 = vadd.f32 %v1661_v0, %v800_v10 }
 0x5e5   :  { %1066 = vmatpush.msra.mxu0 %v1632_v59 }
 0x5e6   :  { %v1021_v35 = vpop.f32.mrf.mxu2 }
 0x5e7   :  { %v1024_v23 = vsel %vm131_vm1, %v1021_v35, -inf  ;;  %1067 = vmatpush.msra.mxu0 %v1635_v60 }
 0x5e8   :  { %1025 = vmax.xlane.f32.xlu0 %v1024_v23 }
 0x5ea   :  { %1304 = vmatmul.msk.f32.vlgmr.msra.gmra.mxu0 %vm56_vm0, %v1652_v22 }
 0x5ee   :  { %v1141_v37 = vpop.f32.mrf.mxu2 }
 0x5ef   :  { %1308 = vmatpush.xpose.msk.msrb.mxu0 %vm56_vm0, %v1141_v37 }
 0x5f2   :  { %1309 = vmatmul.msk.f32.vlgmr.msrb.gmra.mxu0 %vm56_vm0, %v1117_v24 }
 0x65b   :  { %v1026_v57 = vpop.xlane.xlu0 %1025 }
 0x65c   :  { %v1027_v25 = vsub.f32 %v1021_v35, %v1026_v57 }
 0x65e   :  { %v1028_v59 = vmul.f32 1.442695, %v1027_v25 }
 0x65f   :  { %v946_v38 = vpop.f32.mrf.mxu0 }
 0x660   :  { %1342 = vpow2.f32 %v1028_v59  ;;  %v949_v43 = vadd.f32 %v946_v38, %v803_v58 }
 0x666   :  { %v1343_v16 = vpop.eup %1342 }
 0x667   :  { %v1069_v60 = vpop.f32.mrf.mxu0  ;;  %v1030_v44 = vsel %vm131_vm1, %v1343_v16, 0.0 }
 0x668   :  { %1031 = vadd.xlane.f32.xlu1 %v1030_v44  ;;  %1090 = vmatpush.msra.mxu1 %v1069_v60 }
 0x66a   :  { %1210 = vmatpush.msrb.mxu1 %v1670_v39 }
 0x66c   :  { %1211 = vmatpush.msrb.mxu1 %v1673_v40 }
 0x66e   :  { %1212 = vmatpush.msrb.mxu1 %v1675_v41 }
 0x66f   :  { %v1167_v45 = vpop.f32.mrf.mxu0 }
 0x670   :  { %1213 = vmatpush.msrb.mxu1 %v1678_v42  ;;  %v1170_v0 = vsel %vm131_vm1, %v1167_v45, -inf }
 0x671   :  { %1171 = vmax.xlane.f32.xlu2 %v1170_v0 }
 0x6db   :  { %v1032_v2 = vpop.xlane.xlu1 %1031 }
 0x6dc   :  { %1344 = vrcp.f32 %v1032_v2  ;;  %v1044_v31 = vand.u32 2147483648, %v1032_v2  ;;  %v1042_v39 = vand.u32 2147483647, %v1032_v2  ;;  %vm1038_vm13 = vweird.f32 %v1032_v2 }
 0x6de   :  { %v1045_v41 = vor.u32 1.1754944e-38, %v1044_v31  ;;  %vm1043_vm15 = vcmp.eq.f32.partialorder %v1042_v39, 8.507059e+37 }
 0x6e2   :  { %v1345_v9 = vpop.eup %1344 }
 0x6e3   :  { %v1034_v12 = vmul.f32 %v1345_v9, %v1032_v2  ;;  %vm1039_vm12 = vweird.f32 %v1345_v9 }
 0x6e4   :  { %v1172_v19 = vpop.xlane.xlu2 %1171  ;;  %vm1040_vm14 = vmor %vm1038_vm13, %vm1039_vm12 }
 0x6e5   :  { %v1035_v20 = vsub.f32 1.0, %v1034_v12  ;;  %v1173_v30 = vsub.f32 %v1167_v45, %v1172_v19 }
 0x6e7   :  { %v1036_v34 = vmul.f32 %v1345_v9, %v1035_v20  ;;  %v1174_v40 = vmul.f32 1.442695, %v1173_v30 }
 0x6e9   :  { %v1037_v36 = vadd.f32 %v1345_v9, %v1036_v34  ;;  %1346 = vpow2.f32 %v1174_v40 }
 0x6eb   :  { %v1041_v42 = vsel %vm1040_vm14, %v1345_v9, %v1037_v36 }
 0x6ec   :  { %v1046_v53 = vsel %vm1043_vm15, %v1045_v41, %v1041_v42 }
 0x6ed   :  { %v1047_v54 = vmul.f32 %v1343_v16, %v1046_v53 }
 0x6ef   :  { %v1347_v55 = vpop.eup %1346  ;;  %1305 = vmatmul.msk.f32.vlgmr.msra.gmra.mxu1 %vm131_vm1, %v1047_v54 }
 0x6f0   :  { %v1176_v62 = vsel %vm131_vm1, %v1347_v55, 0.0 }
 0x6f1   :  { %1177 = vadd.xlane.f32.xlu0 %v1176_v62 }
 0x6f7   :  { %1310 = vmatmul.msk.f32.vlgmr.msrb.gmra.mxu1 %vm56_vm0, %v1652_v22 }
 0x764   :  { %v1178_v3 = vpop.xlane.xlu0 %1177 }
 0x765   :  { %1348 = vrcp.f32 %v1178_v3  ;;  %v1190_v49 = vand.u32 2147483648, %v1178_v3  ;;  %v1188_v56 = vand.u32 2147483647, %v1178_v3  ;;  %vm1184_vm3 = vweird.f32 %v1178_v3 }
 0x767   :  { %v1191_v61 = vor.u32 1.1754944e-38, %v1190_v49  ;;  %vm1189_vm5 = vcmp.eq.f32.partialorder %v1188_v56, 8.507059e+37 }
 0x76b   :  { %v1349_v47 = vpop.eup %1348 }
 0x76c   :  { %v1180_v5 = vmul.f32 %v1349_v47, %v1178_v3  ;;  %v1092_v7 = vpop.f32.mrf.mxu1  ;;  %vm1185_vm2 = vweird.f32 %v1349_v47 }
 0x76d   :  { %v1095_v52 = vadd.f32 %v1092_v7, %v949_v43  ;;  %vm1186_vm4 = vmor %vm1184_vm3, %vm1185_vm2 }
 0x76e   :  { %v1181_v48 = vsub.f32 1.0, %v1180_v5 }
 0x770   :  { %v1182_v50 = vmul.f32 %v1349_v47, %v1181_v48 }
 0x772   :  { %v1183_v51 = vadd.f32 %v1349_v47, %v1182_v50 }
 0x774   :  { %v1187_v46 = vsel %vm1186_vm4, %v1349_v47, %v1183_v51  ;;  %v1215_v63 = vpop.f32.mrf.mxu1 }
 0x775   :  { %v1192_v21 = vsel %vm1189_vm5, %v1191_v61, %v1187_v46  ;;  %1236 = vmatpush.msrb.mxu3 %v1215_v63 }
 0x776   :  { %v1193_v22 = vmul.f32 %v1347_v55, %v1192_v21 }
 0x778   :  { %1311 = vmatmul.msk.f32.vlgmr.msrb.gmra.mxu3 %vm131_vm1, %v1193_v22 }
 0x7fb   :  { %v1238_v1 = vpop.f32.mrf.mxu3 }
 0x7fc   :  { %v1241_v4 = vadd.f32 %v1238_v1, %v1095_v52 }
 0x7fe   :  { %1243 = vst.msk [vmem:[#allocation7 + $0x8] sm:$0xff] %vm56_vm0, %v1241_v4 }
 0x7ff   :  { %1256 = dma.vmem_to_hbm [thread:$0]  %s1249_s24, 256, %s1251_s27, [#allocation4], %s1429_s20, %s1429_s20, %s1430_s21  }
 0x800   :  { %1426 = dma.done.wait [#allocation4], 256  }
 0x801   :  { %1427 = vsyncadd [#allocation4], 4294967040 }
 0x802   :  { %1261 = vsyncpa [#allocation3], 1 }
 0x803   :  { %1262 = vsyncpa [#allocation6], 1 }
 0x804   :  { %1263 = vsyncpa [#allocation4], 1 }

</bundles_post_ra>
